<compile_context>
chip_gen: v6e
topology: v6e:2x2x1
jax: 0.10.0
libtpu: 0.0.40
codegen_flags: <defaults>
</compile_context>

<pallas_src>
import jax
import jax.numpy as jnp
from jax import lax
from jax.experimental import pallas as pl
from jax.experimental.pallas import tpu as pltpu


# Per-step VMEM budget for the "whole group resident" fused path
# (~ double-buffered input + double-buffered output = 4x block).  Kept <= 40 MiB so the
# same block choice is safe on v7x (64 MiB physical VMEM) as well as v5e/v6e (128 MiB).
_FUSED_VMEM_BUDGET = 40 << 20
_VMEM_LIMIT_CAP = 48 << 20


def _make_fused_group_kernel(eps, inv_n):
    """One grid step owns every element of one group (whole batch) in VMEM.

    x_ref: (N, Cg, HW) on the aligned path, (1, N, M) on the transposed fallback.
    w_ref/b_ref: broadcastable against x_ref ((1, Cg, 1) resp. (1, 1, M)).
    """
    def kernel(x_ref, w_ref, b_ref, o_ref):
        x = x_ref[...]
        # Single fused statistics pass, f32 accumulation, no full-tile f32 copy
        # and no full-size `centered` temporary.
        s = jnp.sum(x, dtype=jnp.float32)
        ss = jnp.sum(x * x, dtype=jnp.float32)
        mean = s * inv_n
        var = jnp.maximum(ss * inv_n - mean * mean, 0.0)   # clamp E[x^2]-mean^2 form
        inv = lax.rsqrt(var + eps)
        # Fold normalize + affine into one per-channel scale/shift mul-add.
        scale = inv * w_ref[...].astype(jnp.float32)
        shift = b_ref[...].astype(jnp.float32) - mean * scale
        o_ref[...] = (x * scale + shift).astype(o_ref.dtype)
    return kernel


def _stats_kernel(x_ref, sum_ref, sq_ref):
    """Tiled pass 1: accumulate per-group sum / sum-of-squares over HW chunks."""
    @pl.when(pl.program_id(1) == 0)
    def _init():
        sum_ref[...] = jnp.zeros_like(sum_ref)
        sq_ref[...] = jnp.zeros_like(sq_ref)

    x = x_ref[...]
    sum_ref[...] += jnp.sum(x, dtype=jnp.float32)
    sq_ref[...] += jnp.sum(x * x, dtype=jnp.float32)


def _apply_kernel(x_ref, scale_ref, shift_ref, o_ref):
    """Tiled pass 2: y = x * scale[c] + shift[c] (normalize + affine, folded)."""
    o_ref[...] = (x_ref[...] * scale_ref[...] + shift_ref[...]).astype(o_ref.dtype)


def _pick_hw_tile(hw, max_hw):
    """Largest multiple-of-128 divisor of hw that is <= max_hw (None if none)."""
    t = (max_hw // 128) * 128
    while t >= 128:
        if hw % t == 0:
            return t
        t -= 128
    return None


def _two_pass_grouped(x3, weight, bias, G, Cg, hw_t, eps, n_per_group, itemsize):
    """Tiled two-pass path for groups too large for VMEM (2R + 1W of HBM)."""
    N, C, HW = x3.shape
    kh = HW // hw_t
    block_bytes = N * Cg * hw_t * itemsize
    vmem_limit = int(min(max(4 * block_bytes + (4 << 20), 16 << 20), _VMEM_LIMIT_CAP))

    # --- pass 1: per-group sum / sum-of-squares, accumulated across HW chunks.
    sums, sqs = pl.pallas_call(
        _stats_kernel,
        out_shape=(jax.ShapeDtypeStruct((G, 8, 128), jnp.float32),
                   jax.ShapeDtypeStruct((G, 8, 128), jnp.float32)),
        grid_spec=pltpu.PrefetchScalarGridSpec(
            num_scalar_prefetch=0,
            grid=(G, kh),
            in_specs=[pl.BlockSpec((N, Cg, hw_t), lambda g, k: (0, g, k))],
            out_specs=(pl.BlockSpec((1, 8, 128), lambda g, k: (g, 0, 0)),
                       pl.BlockSpec((1, 8, 128), lambda g, k: (g, 0, 0))),
        ),
        compiler_params=pltpu.CompilerParams(
            dimension_semantics=("parallel", "arbitrary"),
            vmem_limit_bytes=vmem_limit),
        cost_estimate=pl.CostEstimate(
            flops=3 * N * C * HW, transcendentals=0,
            bytes_accessed=N * C * HW * itemsize),
    )(x3)

    # Tiny per-group / per-channel glue (G and C elements).
    inv_n = 1.0 / float(n_per_group)
    s = sums[:, 0, 0]
    ss = sqs[:, 0, 0]
    mean = s * inv_n
    var = jnp.maximum(ss * inv_n - mean * mean, 0.0)
    inv = lax.rsqrt(var + eps)
    scale_c = jnp.repeat(inv, Cg) * weight.astype(jnp.float32)     # channel c -> group c//Cg
    shift_c = bias.astype(jnp.float32) - jnp.repeat(mean, Cg) * scale_c
    scale3 = scale_c.reshape(1, C, 1)
    shift3 = shift_c.reshape(1, C, 1)

    # --- pass 2: normalize + affine.  Both grid axes are independent, so both feed
    # the v7x megacore even when G is small.
    out3 = pl.pallas_call(
        _apply_kernel,
        out_shape=jax.ShapeDtypeStruct((N, C, HW), x3.dtype),
        grid_spec=pltpu.PrefetchScalarGridSpec(
            num_scalar_prefetch=0,
            grid=(G, kh),
            in_specs=[
                pl.BlockSpec((N, Cg, hw_t), lambda g, k: (0, g, k)),
                pl.BlockSpec((1, Cg, 1), lambda g, k: (0, g, 0)),
                pl.BlockSpec((1, Cg, 1), lambda g, k: (0, g, 0)),
            ],
            out_specs=pl.BlockSpec((N, Cg, hw_t), lambda g, k: (0, g, k)),
        ),
        compiler_params=pltpu.CompilerParams(
            dimension_semantics=("parallel", "parallel"),
            vmem_limit_bytes=vmem_limit),
        cost_estimate=pl.CostEstimate(
            flops=2 * N * C * HW, transcendentals=0,
            bytes_accessed=2 * N * C * HW * itemsize),
    )(x3, scale3, shift3)
    return out3


def group_batch_norm(x, weight, bias, num_groups, eps=1e-5, *,
                     fused_vmem_budget=_FUSED_VMEM_BUDGET):
    """Pallas GroupBatchNorm forward.  x is (N, C, *spatial), weight/bias are (C,)."""
    orig_shape = x.shape
    N, C = x.shape[0], x.shape[1]
    G = num_groups
    total = 1
    for d in x.shape[1:]:
        total *= d
    assert total % G == 0, "C*prod(spatial) must be divisible by num_groups"
    M = total // G                    # elements per group per sample
    HW = total // C                   # spatial elements per channel
    itemsize = x.dtype.itemsize
    n_per_group = N * M
    inv_n = 1.0 / float(n_per_group)

    # Fast (transpose-free) layout requires whole channels per group and a
    # sublane-aligned channel block.
    channel_aligned = (C % G == 0) and (G == 1 or (C // G) % 8 == 0)

    if channel_aligned:
        Cg = C // G
        x3 = x.reshape(N, C, HW)                     # free view, no data movement
        w3 = weight.reshape(1, C, 1)
        b3 = bias.reshape(1, C, 1)
        block_bytes = N * Cg * HW * itemsize

        hw_t = None
        if 4 * block_bytes > fused_vmem_budget:
            max_hw = max(fused_vmem_budget // (4 * N * Cg * itemsize), 128)
            hw_t = _pick_hw_tile(HW, max_hw)
            # TODO(synk): if HW has no multiple-of-128 divisor (hw_t is None) or
            # N*Cg alone overflows VMEM, we still fall through to the whole-group
            # path below; a mask-tolerant / N-tiled variant would cover that case.

        if hw_t is not None:
            out3 = _two_pass_grouped(x3, weight, bias, G, Cg, hw_t, eps,
                                     n_per_group, itemsize)
            return out3.reshape(orig_shape)

        # --- fused single-pass path: one grid step per group, 1R + 1W of HBM.
        vmem_limit = int(min(max(4 * block_bytes + (4 << 20), 16 << 20),
                             _VMEM_LIMIT_CAP))
        out3 = pl.pallas_call(
            _make_fused_group_kernel(eps, inv_n),
            out_shape=jax.ShapeDtypeStruct((N, C, HW), x.dtype),
            grid_spec=pltpu.PrefetchScalarGridSpec(
                num_scalar_prefetch=0,
                grid=(G,),
                in_specs=[
                    pl.BlockSpec((N, Cg, HW), lambda g: (0, g, 0)),
                    pl.BlockSpec((1, Cg, 1), lambda g: (0, g, 0)),
                    pl.BlockSpec((1, Cg, 1), lambda g: (0, g, 0)),
                ],
                out_specs=pl.BlockSpec((N, Cg, HW), lambda g: (0, g, 0)),
            ),
            compiler_params=pltpu.CompilerParams(
                dimension_semantics=("parallel",),
                vmem_limit_bytes=vmem_limit),
            cost_estimate=pl.CostEstimate(
                flops=8 * N * C * HW, transcendentals=G,
                bytes_accessed=2 * N * C * HW * itemsize + 2 * C * 4),
        )(x3, w3, b3)
        return out3.reshape(orig_shape)

    # ---- fallback: channels-per-group not sublane-aligned -> group-major layout.
    # Costs two full-tensor transposes and a per-position weight map (in x.dtype),
    # only taken for odd C//G configurations.
    x_g = x.reshape(N, G, M).transpose(1, 0, 2)                   # (G, N, M)
    w_g = jnp.repeat(weight, HW).reshape(G, 1, M).astype(x.dtype)
    b_g = jnp.repeat(bias, HW).reshape(G, 1, M).astype(x.dtype)
    block_bytes = N * M * itemsize
    vmem_limit = int(min(max(4 * block_bytes + 4 * M * itemsize + (4 << 20), 16 << 20),
                         _VMEM_LIMIT_CAP))
    # TODO(synk): no tiled variant for the unaligned layout; very large odd-Cg groups
    # could exceed the VMEM limit here.
    out_g = pl.pallas_call(
        _make_fused_group_kernel(eps, inv_n),
        out_shape=jax.ShapeDtypeStruct((G, N, M), x.dtype),
        grid_spec=pltpu.PrefetchScalarGridSpec(
            num_scalar_prefetch=0,
            grid=(G,),
            in_specs=[
                pl.BlockSpec((1, N, M), lambda g: (g, 0, 0)),
                pl.BlockSpec((1, 1, M), lambda g: (g, 0, 0)),
                pl.BlockSpec((1, 1, M), lambda g: (g, 0, 0)),
            ],
            out_specs=pl.BlockSpec((1, N, M), lambda g: (g, 0, 0)),
        ),
        compiler_params=pltpu.CompilerParams(
            dimension_semantics=("parallel",),
            vmem_limit_bytes=vmem_limit),
        cost_estimate=pl.CostEstimate(
            flops=8 * N * G * M, transcendentals=G,
            bytes_accessed=(2 * N + 2) * G * M * itemsize),
    )(x_g, w_g, b_g)
    return out_g.transpose(1, 0, 2).reshape(orig_shape)


def group_batch_norm_ref(x, weight, bias, num_groups, eps=1e-5):
    """Pure-JAX reference matching the PyTorch forward (training-mode batch stats)."""
    orig_shape = x.shape
    N, C = x.shape[0], x.shape[1]
    xg = x.reshape(N, num_groups, -1).astype(jnp.float32)
    mean = xg.mean(axis=(0, 2), keepdims=True)
    var = ((xg - mean) ** 2).mean(axis=(0, 2), keepdims=True)
    y = (xg - mean) / jnp.sqrt(var + eps)
    y = y.reshape(N, C, -1)
    y = y * weight.reshape(1, C, 1).astype(jnp.float32) \
        + bias.reshape(1, C, 1).astype(jnp.float32)
    return y.reshape(orig_shape).astype(x.dtype)


if __name__ == "__main__":
    key = jax.random.PRNGKey(0)
    kx1, kx2, kw1, kb1, kw2, kb2 = jax.random.split(key, 6)

    # 1) Aligned fast path (no transposes): Cg = C//G = 8 channels per group.
    N, C, H, W, G = 2, 32, 16, 16, 4
    x = jax.random.normal(kx1, (N, C, H, W), dtype=jnp.float32)
    # Module's reset_parameters() sets weight=ones, bias=zeros; perturb so the
    # affine path is actually exercised.
    weight = jnp.ones((C,), jnp.float32) + 0.1 * jax.random.normal(kw1, (C,), jnp.float32)
    bias = 0.1 * jax.random.normal(kb1, (C,), jnp.float32)

    out = jax.block_until_ready(group_batch_norm(x, weight, bias, G))
    ref = group_batch_norm_ref(x, weight, bias, G)
    assert out.shape == x.shape and out.dtype == x.dtype
    assert jnp.allclose(out, ref, atol=1e-4, rtol=1e-4), "fused path mismatch"

    # 2) Same problem, but force the tiled two-pass path with a tiny VMEM budget.
    out_tiled = jax.block_until_ready(
        group_batch_norm(x, weight, bias, G, fused_vmem_budget=32 * 1024))
    assert jnp.allclose(out_tiled, ref, atol=1e-4, rtol=1e-4), "tiled path mismatch"

    # 3) Unaligned channels-per-group (Cg = 2): transposed fallback path.
    N2, C2, G2 = 2, 4, 2
    x2 = jax.random.normal(kx2, (N2, C2, H, W), dtype=jnp.float32)
    w2 = jnp.ones((C2,), jnp.float32) + 0.1 * jax.random.normal(kw2, (C2,), jnp.float32)
    b2 = 0.1 * jax.random.normal(kb2, (C2,), jnp.float32)
    out2 = jax.block_until_ready(group_batch_norm(x2, w2, b2, G2))
    ref2 = group_batch_norm_ref(x2, w2, b2, G2)
    assert jnp.allclose(out2, ref2, atol=1e-4, rtol=1e-4), "fallback path mismatch"

    print("KERNEL_OK")
</pallas_src>

<mosaic_0001>
module attributes {stable_mosaic.version = 11 : i64} {
  func.func @kernel(%arg0: i32, %arg1: memref<2x8x256xf32, #tpu.memory_space<vmem>>, %arg2: memref<1x8x1xf32, #tpu.memory_space<vmem>>, %arg3: memref<1x8x1xf32, #tpu.memory_space<vmem>>, %arg4: memref<2x8x256xf32, #tpu.memory_space<vmem>>) attributes {dimension_semantics = [#tpu.dimension_semantics<parallel>], iteration_bounds = array<i64: 4>, scalar_prefetch = 0 : i64, scratch_operands = 0 : i64, tpu.core_type = #tpu.core_type<tc>, window_params = [{transform_indices = @transform_0, window_bounds = array<i64: 2, 8, 256>}, {transform_indices = @transform_1, window_bounds = array<i64: 1, 8, 1>}, {transform_indices = @transform_2, window_bounds = array<i64: 1, 8, 1>}, {transform_indices = @transform_3, window_bounds = array<i64: 2, 8, 256>}]} {
    %c0 = arith.constant 0 : index
    %c0_0 = arith.constant 0 : index
    %c0_1 = arith.constant 0 : index
    %0 = vector.load %arg1[%c0, %c0_0, %c0_1] : memref<2x8x256xf32, #tpu.memory_space<vmem>>, vector<2x8x256xf32>
    %1 = vector.shape_cast %0 : vector<2x8x256xf32> to vector<1x2x8x256xf32>
    %cst = arith.constant dense<0.000000e+00> : vector<1xf32>
    %2 = vector.multi_reduction <add>, %1, %cst [1, 2, 3] : vector<1x2x8x256xf32> to vector<1xf32>
    %3 = vector.shape_cast %2 : vector<1xf32> to vector<1x1x1x1xf32>
    %4 = vector.extract %3[0, 0, 0, 0] : f32 from vector<1x1x1x1xf32>
    %5 = arith.mulf %0, %0 : vector<2x8x256xf32>
    %6 = vector.shape_cast %5 : vector<2x8x256xf32> to vector<1x2x8x256xf32>
    %cst_2 = arith.constant dense<0.000000e+00> : vector<1xf32>
    %7 = vector.multi_reduction <add>, %6, %cst_2 [1, 2, 3] : vector<1x2x8x256xf32> to vector<1xf32>
    %8 = vector.shape_cast %7 : vector<1xf32> to vector<1x1x1x1xf32>
    %9 = vector.extract %8[0, 0, 0, 0] : f32 from vector<1x1x1x1xf32>
    %cst_3 = arith.constant 2.44140625E-4 : f32
    %10 = arith.mulf %4, %cst_3 : f32
    %cst_4 = arith.constant 2.44140625E-4 : f32
    %11 = arith.mulf %9, %cst_4 : f32
    %12 = arith.mulf %10, %10 : f32
    %13 = arith.subf %11, %12 : f32
    %cst_5 = arith.constant 0.000000e+00 : f32
    %14 = arith.maximumf %13, %cst_5 : f32
    %cst_6 = arith.constant 9.99999974E-6 : f32
    %15 = arith.addf %14, %cst_6 : f32
    %16 = math.rsqrt %15 : f32
    %c0_7 = arith.constant 0 : index
    %c0_8 = arith.constant 0 : index
    %c0_9 = arith.constant 0 : index
    %17 = vector.load %arg2[%c0_7, %c0_8, %c0_9] : memref<1x8x1xf32, #tpu.memory_space<vmem>>, vector<1x8x1xf32>
    %18 = vector.broadcast %16 : f32 to vector<1x8x1xf32>
    %19 = arith.mulf %18, %17 : vector<1x8x1xf32>
    %c0_10 = arith.constant 0 : index
    %c0_11 = arith.constant 0 : index
    %c0_12 = arith.constant 0 : index
    %20 = vector.load %arg3[%c0_10, %c0_11, %c0_12] : memref<1x8x1xf32, #tpu.memory_space<vmem>>, vector<1x8x1xf32>
    %21 = vector.broadcast %10 : f32 to vector<1x8x1xf32>
    %22 = arith.mulf %21, %19 : vector<1x8x1xf32>
    %23 = arith.subf %20, %22 : vector<1x8x1xf32>
    %24 = vector.broadcast %19 : vector<1x8x1xf32> to vector<2x8x256xf32>
    %25 = arith.mulf %0, %24 : vector<2x8x256xf32>
    %26 = vector.broadcast %23 : vector<1x8x1xf32> to vector<2x8x256xf32>
    %27 = arith.addf %25, %26 : vector<2x8x256xf32>
    %c0_13 = arith.constant 0 : index
    %c0_14 = arith.constant 0 : index
    %c0_15 = arith.constant 0 : index
    %28 = vector.load %arg4[%c0_13, %c0_14, %c0_15] : memref<2x8x256xf32, #tpu.memory_space<vmem>>, vector<2x8x256xf32>
    tpu.vector_store %arg4[%c0_13, %c0_14, %c0_15], %27 {strides = array<i32>} : memref<2x8x256xf32, #tpu.memory_space<vmem>>, vector<2x8x256xf32>,
    return
  }
  func.func @transform_0(%arg0: i32) -> (i32, i32, i32) {
    %c0_i32 = arith.constant 0 : i32
    %c0_i32_0 = arith.constant 0 : i32
    %c0_i32_1 = arith.constant 0 : i32
    return %c0_i32, %arg0, %c0_i32_0 : i32, i32, i32
  }
  func.func @transform_1(%arg0: i32) -> (i32, i32, i32) {
    %c0_i32 = arith.constant 0 : i32
    %c0_i32_0 = arith.constant 0 : i32
    %c0_i32_1 = arith.constant 0 : i32
    return %c0_i32, %arg0, %c0_i32_0 : i32, i32, i32
  }
  func.func @transform_2(%arg0: i32) -> (i32, i32, i32) {
    %c0_i32 = arith.constant 0 : i32
    %c0_i32_0 = arith.constant 0 : i32
    %c0_i32_1 = arith.constant 0 : i32
    return %c0_i32, %arg0, %c0_i32_0 : i32, i32, i32
  }
  func.func @transform_3(%arg0: i32) -> (i32, i32, i32) {
    %c0_i32 = arith.constant 0 : i32
    %c0_i32_0 = arith.constant 0 : i32
    %c0_i32_1 = arith.constant 0 : i32
    return %c0_i32, %arg0, %c0_i32_0 : i32, i32, i32
  }
}

</mosaic_0001>

<bundles_post_ra>
// kernel: tpu_custom_call.1
= control target key start
LH: loop header
LB: loop body
LE: loop exit
PB: predicated region body
PF: predicated region fallthrough
CT: control target
= control target key end

     0   :  { %8 = vsyncpa [#allocation3], 0  ;;  %s800_s0 = inlined_call_operand.hbm [shape: f32[2,32,256], index: 0, kind: input, shape index: {}]   ;;  %s801_s1 = inlined_call_operand.vmem [shape: f32[1,32,1], index: 1, kind: input, shape index: {}]   ;;  %s802_s2 = inlined_call_operand.vmem [shape: f32[1,32,1], index: 2, kind: input, shape index: {}]   ;;  %s803_s3 = inlined_call_operand.hbm [shape: f32[2,32,256], index: 3, kind: output, shape index: {}]  }
   0x1   :  { %10 = vsyncpa [#allocation3 + $0x1], 0 }
   0x2   :  { %11 = vsyncpa [#allocation4], 0 }
   0x3   :  { %13 = vsyncpa [#allocation4 + $0x1], 0  ;;  %s610_s12 = smov 0   ;;  %s612_s13 = smov 0  }
   0x4   :  { %s614_s14 = smov 0   ;;  %s616_s15 = smov 0  }
   0x5 LB: > { %s631_s16 = sadd.s32 4294967295, %s578_s15   ;;  %s404_s17 = sadd.s32 4294967294, %s578_s15   ;;  %s578_s15 = sphi %s616_s15, %s818_s15   ;;  %s574_s14 = sphi %s614_s14, %s817_s14   ;;  %s570_s13 = sphi %s612_s13, %s816_s13   ;;  %s566_s12 = sphi %s610_s12, %s815_s12  }
   0x6   : > { %s635_s18 = sadd.s32 1, %s578_s15   ;;  %s26_s19 = sadd.s32 1, %s574_s14 }
   0x7   : > { %s23_s20 = ssub.s32 %s578_s15, %s635_s18  ;;  %p33_p0 = scmp.ne.s32.totalorder %s574_s14, %s570_s13 }
   0x8   : > { %p24_p1 = scmp.eq.s32.totalorder %s23_s20, 0  ;;  %p34_p2 = scmp.eq.s32.totalorder %s578_s15, 0 }
   0x9   : > { %p39_p3 = scmp.ne.s32.totalorder %s570_s13, %s566_s12  ;;  %p40_p4 = scmp.eq.s32.totalorder %s631_s16, 0 }
   0xa   : > { %s647_s21 = scalar_select %p24_p1, %s574_s14, %s26_s19  }
   0xb   : > { %p649_p5 = por %p34_p2, %p33_p0  ;;  %p653_p6 = por %p40_p4, %p39_p3 }
   0xc   : > { %p115_p7 = scmp.eq.s32.totalorder %s631_s16, 3  ;;  %p121_p8 = scmp.eq.s32.totalorder %s404_s17, 3 }
   0xd   : > { %s807_s23 = scalar_select %p653_p6, 1, 0 }
   0xe   : > { %p440_p9 = scmp.lt.s32.totalorder %s578_s15, 4  ;;  %p659_p10 = por %p115_p7, %p33_p0 }
   0xf   : > { %p663_p11 = por %p121_p8, %p39_p3  ;;  %s141_s26 = sand.u32 1, %s574_s14  }
  0x10   : > { %s808_s24 = scalar_select %p659_p10, 1, 0 }
  0x11   : > { %s809_s25 = scalar_select %p663_p11, 1, 0 }
  0x12   : > { %s420_s27 = sshll.u32 %s578_s15, 8  ;;  %s407_s28 = sshll.u32 %s141_s26, 5 }
  0x13   : > { %s672_s4 = scalar_lea.hbm %s800_s0, %s420_s27  ;;  %s145_s5 = scalar_lea.vmem [#allocation2], %s407_s28 }
  0x14   : > { %s152_s6 = sshll.u32 %s145_s5, 4  ;;  %p676_p12 = pnand %p440_p9, %p649_p5  ;;  %s680_s6 = int_to_ptr.vmem [resolvable:$true] %s152_s6 }
  0x15   : > { %s683_s8 = scalar_lea.sflag [#allocation3], %s141_s26  ;;  %s486_s9 = scalar_lea.hbm %s672_s4, 512 }
  0x16   : > { %p487_p0 = scmp.ne.s32.totalorder %s672_s4, %s486_s9  ;;  %p488_p1 = pneg %p676_p12 }
  0x17   : > { %s491_s17 = scalar_lea.hbm %s800_s0, 2048  ;;  %p492_p4 = scmp.lt.s32.totalorder %s672_s4, %s800_s0 }
  0x18   : > { %p489_p2 = pnand %p488_p1, %p487_p0  ;;  %p493_p5 = scmp.lt.s32.totalorder %s491_s17, %s486_s9 }
  0x1a   : > { %p490_p3 = pneg %p489_p2  ;;  %p494_p7 = por %p493_p5, %p492_p4 }
  0x1c   : > { %p495_p8 = pnand %p494_p7, %p490_p3 }
  0x1e   : > { %498 = shalt.err (!%p495_p8)
}
  0x1f   : > { %s499_s22 = scalar_lea.vmem %s680_s6, 512  ;;  %s580_s26 = smov [#allocation2]  }
  0x20   : > { %p500_p9 = scmp.ne.s32.totalorder %s680_s6, %s499_s22  ;;  %s504_s27 = sshll.u32 %s580_s26, 4  ;;  %s505_s27 = int_to_ptr.vmem [resolvable:$false] %s504_s27 }
  0x21   : > { %s506_s28 = scalar_lea.vmem %s505_s27, 1024  ;;  %p507_p2 = scmp.lt.s32.totalorder %s680_s6, %s505_s27 }
  0x22   : > { %p502_p13 = pnand %p500_p9, %p488_p1  ;;  %p508_p11 = scmp.lt.s32.totalorder %s506_s28, %s499_s22 }
  0x24   : > { %p503_p0 = pneg %p502_p13  ;;  %p509_p10 = por %p508_p11, %p507_p2 }
  0x26   : > { %p510_p6 = pnand %p509_p10, %p503_p0 }
  0x28   : > { %513 = shalt.err (!%p510_p6)
}
  0x29   : > { %s581_s29 = smov 1024   ;;  %s582_s30 = smov 256  }
  0x2a   : > { %s583_s5 = smov 16   ;;  %p174_p13 = scmp.lt.s32.totalorder %s578_s15, 5 }
  0x2b   : > { %435 = dma.hbm_to_vmem [thread:$0]  (!%p676_p12), %s672_s4, 512, %s680_s6, %s683_s8, %s581_s29, %s582_s30, %s583_s5  }
  0x2c   : > { %p811_p1 = scmp.ge.s32.totalorder %s578_s15, 1 }
  0x2e   : > { %p175_p3 = pnand %p811_p1, %p174_p13 }
  0x2f   : > { %s708_s9 = sand.u32 (!%p175_p3), 1, %s570_s13   ;;  %p812_p6 = scmp.ne.s32.totalorder (!%p175_p3), %s807_s23, 0 }
  0x30   : > { %178 = sbr.rel (%p175_p3) target bundleno = 486 (0x1e6), region = 32  ;;  %s411_s10 = sshll.u32 (!%p175_p3), %s708_s9, 5 }
  0x31   : > { %s181_s11 = scalar_lea.sflag (!%p175_p3), [#allocation3], %s708_s9  ;;  %s184_s17 = scalar_lea.vmem (!%p175_p3), [#allocation2], %s411_s10 }
  0x35   : > { %557 = dma.done.wait (%p812_p6), %s181_s11, 512  }
  0x36   : > { %559 = vsyncadd (%p812_p6), %s181_s11, 4294966784  ;;  %v718_v0 = vld [vmem:[%s184_s17] sm:$0xff]  ;;  %v720_v1 = vld [vmem:[%s184_s17 + $0x8] sm:$0xff]  ;;  %v584_v27 = vmov 0   ;;  %s585_s20 = smov 0.0   ;;  %p215_p10 = scmp.lt.s32.totalorder %s631_s16, 3 }
  0x37   : > { %v722_v2 = vld [vmem:[%s184_s17 + $0x10] sm:$0xff]  ;;  %v227_v3 = vadd.f32 %v720_v1, %v718_v0  ;;  %v239_v4 = vmul.f32 %v718_v0, %v718_v0  ;;  %v240_v5 = vmul.f32 %v720_v1, %v720_v1  ;;  %v732_v7 = vld [vmem:[%s184_s17 + $0x18] sm:$0xff]  ;;  %482 = vset.pattern.permute.xlu1 %v584_v27  ;;  %483 = vset.pattern.permute.xlu0 %v584_v27  ;;  %p813_p12 = scmp.ne.s32.totalorder %s808_s24, 0 }
  0x38   : > { %v241_v6 = vmul.f32 %v722_v2, %v722_v2  ;;  %v242_v9 = vmul.f32 %v732_v7, %v732_v7  ;;  %s216_s27 = scalar_select %p215_p10, %s631_s16, 3 }
  0x39   : > { %v228_v8 = vadd.f32 %v227_v3, %v722_v2  ;;  %v243_v10 = vadd.f32 %v240_v5, %v239_v4 }
  0x3a   : > { %s413_s28 = sshll.u32 %s216_s27, 3 }
  0x3b   : > { %v229_v11 = vadd.f32 %v228_v8, %v732_v7  ;;  %v244_v12 = vadd.f32 %v243_v10, %v241_v6  ;;  %s218_s5 = scalar_lea.vmem %s801_s1, %s413_s28 }
  0x3c   : > { %v264_v31 = vld [vmem:[%s218_s5] sm:$0xff] }
  0x3d   : > { %230 = vadd.xlane.f32.xlu0 %v229_v11  ;;  %v245_v13 = vadd.f32 %v244_v12, %v242_v9 }
  0x41   : > { %246 = vadd.xlane.f32.xlu0 %v245_v13 }
  0xc6   : > { %v231_v14 = vpop.xlane.xlu0 %230 }
  0xc7   : > { %v232_v15 = vrot.slane %v231_v14, 4 }
  0xc9   : > { %v233_v16 = vadd.f32 %v232_v15, %v231_v14 }
  0xca   : > { %v247_v17 = vpop.xlane.xlu0 %246 }
  0xcb   : > { %v234_v18 = vrot.slane %v233_v16, 2  ;;  %v248_v19 = vrot.slane %v247_v17, 4 }
  0xcd   : > { %v249_v20 = vadd.f32 %v248_v19, %v247_v17  ;;  %v235_v21 = vadd.f32 %v234_v18, %v233_v16 }
  0xcf   : > { %v250_v22 = vrot.slane %v249_v20, 2  ;;  %v236_v23 = vrot.slane %v235_v21, 1 }
  0xd1   : > { %v251_v24 = vadd.f32 %v250_v22, %v249_v20  ;;  %v237_v25 = vadd.f32 %v236_v23, %v235_v21 }
  0xd3   : > { %422 = vpush %v237_v25  ;;  %v252_v26 = vrot.slane %v251_v24, 1 }
  0xd5   : > { %v253_v28 = vadd.f32 %v252_v26, %v251_v24 }
  0xd7   : > { %424 = vpush %v253_v28 }
 0x104   : > { %s423_s23 = spop %422 }
 0x105   : > { %s255_s4 = smul.f32 0.00024414063, %s423_s23  ;;  %s222_s23 = scalar_lea.vmem %s802_s2, %s413_s28 }
 0x106   : > { %v267_v35 = vld [vmem:[%s222_s23] sm:$0xff] }
 0x107   : > { %s257_s6 = smul.f32 %s255_s4, %s255_s4  ;;  %v268_v34 = vstv %s255_s4 }
 0x108   : > { %s425_s7 = spop %424 }
 0x109   : > { %s256_s8 = smul.f32 0.00024414063, %s425_s7  ;;  %s214_s7 = scalar_lea.vmem [#allocation5], %s411_s10 }
 0x10b   : > { %s258_s19 = ssub.f32 %s256_s8, %s257_s6  ;;  %s307_s8 = sshll.u32 %s214_s7, 4  ;;  %s753_s8 = int_to_ptr.vmem [resolvable:$true] %s307_s8 }
 0x10d   : > { %s259_s22 = smax.f32 %s585_s20, %s258_s19  ;;  %s421_s19 = sshll.u32 %s631_s16, 8 }
 0x10e   : > { %s260_s26 = sadd.f32 1e-05, %s259_s22  ;;  %s758_s10 = scalar_lea.hbm %s803_s3, %s421_s19 }
 0x10f   : > { %s294_s16 = scalar_lea.sflag [#allocation4], %s708_s9  ;;  %s514_s22 = scalar_lea.vmem %s753_s8, 512 }
 0x110   : > { %v261_v29 = vstv %s260_s26  ;;  %p515_p11 = scmp.ne.s32.totalorder %s753_s8, %s514_s22  ;;  %s586_s26 = smov [#allocation5]  }
 0x111   : > { %484 = vrsqrt.f32 %v261_v29  ;;  %s518_s27 = sshll.u32 %s586_s26, 4  ;;  %s519_s27 = int_to_ptr.vmem [resolvable:$false] %s518_s27 }
 0x112   : > { %p516_p4 = pnand %p515_p11, %p813_p12  ;;  %s520_s28 = scalar_lea.vmem %s519_s27, 1024 }
 0x113   : > { %p521_p7 = scmp.lt.s32.totalorder %s753_s8, %s519_s27  ;;  %p522_p8 = scmp.lt.s32.totalorder %s520_s28, %s514_s22 }
 0x114   : > { %p517_p5 = pneg %p516_p4 }
 0x115   : > { %p523_p9 = por %p522_p8, %p521_p7 }
 0x117   : > { %p524_p0 = pnand %p523_p9, %p517_p5 }
 0x11e   : > { %v485_v30 = vpop.eup %484 }
 0x11f   : > { %426 = vpush %v485_v30 }
 0x150   : > { %s427_s6 = spop %426 }
 0x151   : > { %v265_v32 = vstv %s427_s6 }
 0x152   : > { %v266_v33 = vmul.f32 %v265_v32, %v264_v31 }
 0x154   : > { %v269_v36 = vmul.f32 %v268_v34, %v266_v33  ;;  %273 = vperm.xlu1 %482, %v266_v33  }
 0x156   : > { %v270_v37 = vsub.f32 %v267_v35, %v269_v36 }
 0x158   : > { %282 = vperm.xlu1 %482, %v270_v37  }
 0x1cf   : > { %v274_v38 = vpop.permute.xlu1 %273 }
 0x1d0   : > { %v276_v39 = vmul.f32 %v274_v38, %v718_v0  ;;  %v277_v40 = vmul.f32 %v274_v38, %v720_v1  ;;  %v278_v41 = vmul.f32 %v274_v38, %v722_v2  ;;  %v279_v42 = vmul.f32 %v274_v38, %v732_v7 }
 0x1d3   : > { %v283_v43 = vpop.permute.xlu1 %282 }
 0x1d4   : > { %v285_v44 = vadd.f32 %v283_v43, %v276_v39  ;;  %v286_v45 = vadd.f32 %v283_v43, %v277_v40  ;;  %v287_v46 = vadd.f32 %v283_v43, %v278_v41  ;;  %v288_v47 = vadd.f32 %v283_v43, %v279_v42 }
 0x1d6   : > { %289 = vst [vmem:[%s214_s7] sm:$0xff] %v285_v44  ;;  %290 = vst [vmem:[%s214_s7 + $0x8] sm:$0xff] %v286_v45 }
 0x1d7   : > { %291 = vst [vmem:[%s214_s7 + $0x10] sm:$0xff] %v287_v46  ;;  %292 = vst [vmem:[%s214_s7 + $0x18] sm:$0xff] %v288_v47 }
 0x1d8   : > { %527 = shalt.err (!%p524_p0)
}
 0x1d9   : > { %s528_s29 = scalar_lea.hbm %s758_s10, 512  ;;  %s532_s11 = scalar_lea.hbm %s803_s3, 2048 }
 0x1da   : > { %p529_p2 = scmp.ne.s32.totalorder %s758_s10, %s528_s29  ;;  %p533_p3 = scmp.lt.s32.totalorder %s758_s10, %s803_s3 }
 0x1db   : > { %p534_p6 = scmp.lt.s32.totalorder %s532_s11, %s528_s29 }
 0x1dc   : > { %p530_p13 = pnand %p529_p2, %p813_p12 }
 0x1dd   : > { %p535_p10 = por %p534_p6, %p533_p3 }
 0x1de   : > { %p531_p1 = pneg %p530_p13 }
 0x1e0   : > { %p536_p11 = pnand %p535_p10, %p531_p1 }
 0x1e2   : > { %539 = shalt.err (!%p536_p11)
}
 0x1e3   : > { %s587_s6 = smov 256   ;;  %s588_s7 = smov 1024  }
 0x1e4   : > { %s589_s19 = smov 16  }
 0x1e5   : > { %430 = dma.vmem_to_hbm [thread:$0]  (%p813_p12), %s753_s8, 512, %s758_s10, %s294_s16, %s587_s6, %s588_s7, %s589_s19  }
 0x1e6 PF: > { %p441_p4 = scmp.ge.s32.totalorder %s578_s15, 2  ;;  %s322_s4 = sand.u32 1, %s566_s12  }
 0x1e7   : > { %p814_p5 = scmp.ne.s32.totalorder %s809_s25, 0  ;;  %s323_s20 = scalar_lea.sflag [#allocation4], %s322_s4 }
 0x1e9   : > { %p437_p7 = pnand %p441_p4, %p814_p5 }
 0x1eb   : > { %p438_p8 = pneg %p437_p7 }
 0x1ed   : > { %561 = dma.done.wait (%p438_p8), %s323_s20, 512  }
 0x1ee   : > { %563 = vsyncadd (%p438_p8), %s323_s20, 4294966784  ;;  %p16_p9 = scmp.ge.s32.totalorder %s635_s18, 6   ;;  %s815_s12 = smov %s570_s13 }
 0x1ef   : > { %s816_s13 = smov %s574_s14  ;;  %s817_s14 = smov %s647_s21 }
 0x1f0   : > { %s818_s15 = smov %s635_s18  ;;  %18 = sbr.rel (!%p16_p9) target bundleno = 5 (0x5), region = 83 }
 0x1f5   :  { %328 = vsyncpa [#allocation3], 1 }
 0x1f6   :  { %330 = vsyncpa [#allocation3 + $0x1], 1 }
 0x1f7   :  { %331 = vsyncpa [#allocation4], 1 }
 0x1f8   :  { %333 = vsyncpa [#allocation4 + $0x1], 1 }

</bundles_post_ra>
